<compile_context>
chip_gen: v6e
topology: v6e:2x2x1
jax: 0.10.0
libtpu: 0.0.40
codegen_flags: <defaults>
</compile_context>

<pallas_src>
import math
from functools import partial

import jax
import jax.numpy as jnp
import numpy as np
from jax.experimental import pallas as pl
from jax.experimental.pallas import tpu as pltpu


# ---------------------------------------------------------------------------
# Helpers (plain numpy / JAX glue)
# ---------------------------------------------------------------------------
def _round_up(n: int, m: int) -> int:
    return ((n + m - 1) // m) * m


def _adaptive_pool_matrix(in_size: int, out_size: int) -> np.ndarray:
    """(out_size, in_size) averaging matrix matching nn.AdaptiveAvgPool2d bins."""
    m = np.zeros((out_size, in_size), dtype=np.float32)
    for i in range(out_size):
        start = (i * in_size) // out_size
        end = -(-((i + 1) * in_size) // out_size)  # ceil div
        m[i, start:end] = 1.0 / float(end - start)
    return m


def _mlp_k_tiling(fin: int):
    """(TK, n_k, fin_pad) for the MLP contraction over in_features."""
    if fin <= 2048:
        return fin, 1, fin                      # single K block (full dim -> legal)
    n_k = -(-fin // 2048)                       # ceil
    tk = _round_up(-(-fin // n_k), 128)         # lane-aligned K tile
    return tk, n_k, n_k * tk


# ---------------------------------------------------------------------------
# Pallas kernels
# ---------------------------------------------------------------------------
def _pool_kernel(x_ref, m_ref, o_ref):
    # (TR, H*W) @ (H*W, 128) -> (TR, 128)  lane-dense adaptive avg-pool matmul.
    # bf16 MXU operands, f32 accumulation, bf16 store.
    o_ref[...] = jnp.dot(
        x_ref[...].astype(jnp.bfloat16), m_ref[...],
        preferred_element_type=jnp.float32,
    ).astype(o_ref.dtype)


def _mlp_kernel(f_ref, w1_ref, b1_ref, w2_ref, b2_ref, o_ref, h_acc, y_acc):
    # grid = (hidden blocks j, in_feature blocks k); k innermost.
    #   h_acc  += f[:, k] @ W1[k, j]                      (per-j reduction over k)
    #   at k==last:  h = relu(h_acc + b1[j]); y_acc += h @ W2[j]
    #   at (j,k)==last: out = relu(y_acc)    (y_acc was seeded with b2)
    j = pl.program_id(0)
    k = pl.program_id(1)
    nj = pl.num_programs(0)
    nk = pl.num_programs(1)

    @pl.when((j == 0) & (k == 0))
    def _():
        y_acc[...] = jnp.zeros_like(y_acc) + b2_ref[...]

    @pl.when(k == 0)
    def _():
        h_acc[...] = jnp.zeros_like(h_acc)

    h_acc[...] += jnp.dot(f_ref[...], w1_ref[...],
                          preferred_element_type=jnp.float32)

    @pl.when(k == nk - 1)
    def _():
        h = jnp.maximum(h_acc[...] + b1_ref[...], 0.0)
        y_acc[...] += jnp.dot(h.astype(jnp.bfloat16), w2_ref[...],
                              preferred_element_type=jnp.float32)

    @pl.when((j == nj - 1) & (k == nk - 1))
    def _():
        o_ref[...] = jnp.maximum(y_acc[...], 0.0)


# ---------------------------------------------------------------------------
# Jitted forward (padding / reshapes are small static-shape XLA glue)
# ---------------------------------------------------------------------------
@partial(jax.jit, static_argnames=("out_channels",))
def _extract_feature_forward(x, m_pad, w1_pad, b1, w2_pad, b2_pad, *, out_channels):
    B, C, H, W = x.shape
    HW = H * W
    BC = B * C

    # ---- adaptive avg-pool as a row-tiled matmul (no padding of x) --------
    x_flat = x.reshape(BC, HW)                       # free reshape
    x_bytes = 4 if x.dtype == jnp.float32 else 2
    # keep the x block <= ~3 MiB so double-buffering fits v5e's 16 MiB scoped VMEM
    max_tr = max(8, (3 * 1024 * 1024 // (HW * x_bytes)) // 8 * 8)
    TR = min(512, max_tr)
    if BC <= TR:
        TR = BC                                      # single (full-dim) block

    pooled = pl.pallas_call(
        _pool_kernel,
        out_shape=jax.ShapeDtypeStruct((BC, 128), jnp.bfloat16),
        grid=(pl.cdiv(BC, TR),),
        in_specs=[
            pl.BlockSpec((TR, HW), lambda i: (i, 0)),    # streamed row tiles of x
            pl.BlockSpec((HW, 128), lambda i: (0, 0)),   # resident bf16 pool matrix
        ],
        out_specs=pl.BlockSpec((TR, 128), lambda i: (i, 0)),
        compiler_params=pltpu.CompilerParams(
            dimension_semantics=("parallel",),
            vmem_limit_bytes=32 * 1024 * 1024,
        ),
    )(x_flat, m_pad)

    # ---- compact the (tiny) pooled slab to the PyTorch flatten layout -----
    fin = C * 49
    feats = pooled.reshape(B, C, 128)[:, :, :49].reshape(B, fin)   # c*49 + p*7 + q

    TK, n_k, fin_pad = _mlp_k_tiling(fin)
    B_pad = _round_up(B, 8)
    if B_pad != B or fin_pad != fin:
        feats = jnp.pad(feats, ((0, B_pad - B), (0, fin_pad - fin)))

    hid = w1_pad.shape[1]
    out_pad = w2_pad.shape[1]
    TN = 512                                           # hid == 2048 always divisible
    grid_n = hid // TN

    y_pad = pl.pallas_call(
        _mlp_kernel,
        out_shape=jax.ShapeDtypeStruct((B_pad, out_pad), jnp.float32),
        grid=(grid_n, n_k),
        in_specs=[
            pl.BlockSpec((B_pad, TK), lambda j, k: (0, k)),      # activations (tiny)
            pl.BlockSpec((TK, TN), lambda j, k: (k, j)),         # compact W1 stream
            pl.BlockSpec((1, TN), lambda j, k: (0, j)),          # b1 block
            pl.BlockSpec((TN, out_pad), lambda j, k: (j, 0)),    # W2 block (per j)
            pl.BlockSpec((1, out_pad), lambda j, k: (0, 0)),     # resident b2
        ],
        out_specs=pl.BlockSpec((B_pad, out_pad), lambda j, k: (0, 0)),
        scratch_shapes=[
            pltpu.VMEM((B_pad, TN), jnp.float32),       # h accumulator (per j)
            pltpu.VMEM((B_pad, out_pad), jnp.float32),  # output accumulator
        ],
        compiler_params=pltpu.CompilerParams(
            dimension_semantics=("arbitrary", "arbitrary"),
            vmem_limit_bytes=32 * 1024 * 1024,
        ),
    )(feats, w1_pad, b1.reshape(1, hid), w2_pad, b2_pad.reshape(1, out_pad))

    return y_pad[:B, :out_channels]


# ---------------------------------------------------------------------------
# Module
# ---------------------------------------------------------------------------
class ExtractFeature:
    def __init__(self, in_channels, out_channels, key):
        assert in_channels % 49 == 0, "in_channels must equal C * 7 * 7"
        self.in_channels = in_channels
        self.out_channels = out_channels
        self.hid_channels = 2048
        self._C = in_channels // 49

        k1, k2, k3, k4 = jax.random.split(key, 4)
        # Deterministic synthetic init (c2_xavier_fill-style uniform bounds).
        bnd1 = math.sqrt(6.0 / in_channels)
        bnd2 = math.sqrt(6.0 / self.hid_channels)
        w1 = jax.random.uniform(k1, (in_channels, self.hid_channels), jnp.float32, -bnd1, bnd1)
        b1 = jax.random.uniform(k2, (self.hid_channels,), jnp.float32, -bnd1, bnd1)
        w2 = jax.random.uniform(k3, (self.hid_channels, out_channels), jnp.float32, -bnd2, bnd2)
        b2 = jax.random.uniform(k4, (out_channels,), jnp.float32, -bnd2, bnd2)

        # bf16 weight storage for the kernels; f32 views of the same (rounded)
        # values for the reference check. Biases stay f32.
        w1_bf = w1.astype(jnp.bfloat16)
        w2_bf = w2.astype(jnp.bfloat16)
        self.w1 = w1_bf.astype(jnp.float32)
        self.w2 = w2_bf.astype(jnp.float32)
        self.b1 = b1
        self.b2 = b2

        # Kernel weights: W1 kept COMPACT, only zero-padded on the contraction
        # dim to the K-tiling used by the MLP kernel; W2/b2 lane-padded to 128.
        hid = self.hid_channels
        _, _, fin_pad = _mlp_k_tiling(in_channels)
        out_pad = _round_up(out_channels, 128)
        self.w1_pad = (
            jnp.zeros((fin_pad, hid), jnp.bfloat16).at[:in_channels, :].set(w1_bf)
        )
        self.w2_pad = (
            jnp.zeros((hid, out_pad), jnp.bfloat16).at[:, :out_channels].set(w2_bf)
        )
        self.b2_pad = jnp.zeros((out_pad,), jnp.float32).at[:out_channels].set(b2)

        self._pool_mats = {}  # (H, W) -> (H*W, 128) lane-dense bf16 pooling matrix

    def _pool_matrix(self, H, W):
        key = (H, W)
        if key not in self._pool_mats:
            ph = _adaptive_pool_matrix(H, 7)  # (7, H)
            pw = _adaptive_pool_matrix(W, 7)  # (7, W)
            m = np.zeros((H * W, 128), dtype=np.float32)
            # M[h*W + w, p*7 + q] = ph[p, h] * pw[q, w]; columns 49..127 stay 0.
            m[:, :49] = np.kron(ph.T, pw.T)
            self._pool_mats[key] = jnp.asarray(m, dtype=jnp.bfloat16)
        return self._pool_mats[key]

    def __call__(self, x):
        B, C, H, W = x.shape
        assert C == self._C, "channel count must match in_channels // 49"
        m_pad = self._pool_matrix(H, W)
        y = _extract_feature_forward(
            x, m_pad, self.w1_pad, self.b1, self.w2_pad, self.b2_pad,
            out_channels=self.out_channels,
        )
        return [y]  # module returns a list


# ---------------------------------------------------------------------------
# Plain-JAX reference for sanity check
# ---------------------------------------------------------------------------
def _reference(x, w1, b1, w2, b2):
    B, C, H, W = x.shape
    ph = jnp.asarray(_adaptive_pool_matrix(H, 7))
    pw = jnp.asarray(_adaptive_pool_matrix(W, 7))
    pooled = jnp.einsum("ph,bchw,qw->bcpq", ph, x, pw)
    feats = pooled.reshape(B, -1)
    h = jnp.maximum(feats @ w1 + b1, 0.0)
    return jnp.maximum(h @ w2 + b2, 0.0)


if __name__ == "__main__":
    key = jax.random.PRNGKey(0)
    kx, kp = jax.random.split(key)

    B, C, H, W = 2, 4, 16, 16
    in_channels = C * 7 * 7          # flattened pooled size (Linear in_features)
    out_channels = 32

    x = jax.random.normal(kx, (B, C, H, W), dtype=jnp.float32)

    module = ExtractFeature(in_channels, out_channels, kp)
    out_list = module(x)
    y = out_list[0]
    jax.block_until_ready(y)

    assert y.shape == (B, out_channels) and y.dtype == jnp.float32

    y_ref = _reference(x, module.w1, module.b1, module.w2, module.b2)
    np.testing.assert_allclose(np.asarray(y), np.asarray(y_ref), rtol=5e-2, atol=5e-2)

    print("KERNEL_OK")
</pallas_src>

<mosaic_0001>
module attributes {stable_mosaic.version = 11 : i64} {
  func.func @_pool_kernel(%arg0: i32, %arg1: memref<8x256xf32, #tpu.memory_space<vmem>>, %arg2: memref<256x128xbf16, #tpu.memory_space<vmem>>, %arg3: memref<8x128xbf16, #tpu.memory_space<vmem>>) attributes {dimension_semantics = [#tpu.dimension_semantics<parallel>], iteration_bounds = array<i64: 1>, scalar_prefetch = 0 : i64, scratch_operands = 0 : i64, tpu.core_type = #tpu.core_type<tc>, window_params = [{transform_indices = @transform_0, window_bounds = array<i64: 8, 256>}, {pipeline_mode = #tpu.pipeline_mode<synchronous>, transform_indices = @transform_1, window_bounds = array<i64: 256, 128>}, {transform_indices = @transform_2, window_bounds = array<i64: 8, 128>}]} {
    %c0 = arith.constant 0 : index
    %c0_0 = arith.constant 0 : index
    %0 = vector.load %arg1[%c0, %c0_0] : memref<8x256xf32, #tpu.memory_space<vmem>>, vector<8x256xf32>
    %1 = arith.truncf %0 : vector<8x256xf32> to vector<8x256xbf16>
    %c0_1 = arith.constant 0 : index
    %c0_2 = arith.constant 0 : index
    %2 = vector.load %arg2[%c0_1, %c0_2] : memref<256x128xbf16, #tpu.memory_space<vmem>>, vector<256x128xbf16>
    %cst = arith.constant dense<0.000000e+00> : vector<8x128xf32>
    %3 = tpu.matmul %1, %2, %cst {dimension_numbers = #tpu.dot_dimension_numbers<[1], [0], [0], [1], [0, 0, 1, 1], [], []>} : vector<8x256xbf16>, vector<256x128xbf16>, vector<8x128xf32> -> vector<8x128xf32>
    %4 = arith.truncf %3 : vector<8x128xf32> to vector<8x128xbf16>
    %c0_3 = arith.constant 0 : index
    %c0_4 = arith.constant 0 : index
    %5 = vector.load %arg3[%c0_3, %c0_4] : memref<8x128xbf16, #tpu.memory_space<vmem>>, vector<8x128xbf16>
    tpu.vector_store %arg3[%c0_3, %c0_4], %4 {strides = array<i32>} : memref<8x128xbf16, #tpu.memory_space<vmem>>, vector<8x128xbf16>,
    return
  }
  func.func @transform_0(%arg0: i32) -> (i32, i32) {
    %c0_i32 = arith.constant 0 : i32
    %c0_i32_0 = arith.constant 0 : i32
    return %arg0, %c0_i32 : i32, i32
  }
  func.func @transform_1(%arg0: i32) -> (i32, i32) {
    %c0_i32 = arith.constant 0 : i32
    %c0_i32_0 = arith.constant 0 : i32
    %c0_i32_1 = arith.constant 0 : i32
    return %c0_i32, %c0_i32_0 : i32, i32
  }
  func.func @transform_2(%arg0: i32) -> (i32, i32) {
    %c0_i32 = arith.constant 0 : i32
    %c0_i32_0 = arith.constant 0 : i32
    return %arg0, %c0_i32 : i32, i32
  }
}

module attributes {stable_mosaic.version = 11 : i64} {
  func.func @_mlp_kernel(%arg0: i32, %arg1: i32, %arg2: memref<8x196xbf16, #tpu.memory_space<vmem>>, %arg3: memref<196x512xbf16, #tpu.memory_space<vmem>>, %arg4: memref<1x512xf32, #tpu.memory_space<vmem>>, %arg5: memref<512x128xbf16, #tpu.memory_space<vmem>>, %arg6: memref<1x128xf32, #tpu.memory_space<vmem>>, %arg7: memref<8x128xf32, #tpu.memory_space<vmem>>, %arg8: memref<8x512xf32, #tpu.memory_space<vmem>>, %arg9: memref<8x128xf32, #tpu.memory_space<vmem>>) attributes {dimension_semantics = [#tpu.dimension_semantics<arbitrary>, #tpu.dimension_semantics<arbitrary>], iteration_bounds = array<i64: 4, 1>, scalar_prefetch = 0 : i64, scratch_operands = 2 : i64, tpu.core_type = #tpu.core_type<tc>, window_params = [{transform_indices = @transform_0, window_bounds = array<i64: 8, 196>}, {transform_indices = @transform_1, window_bounds = array<i64: 196, 512>}, {transform_indices = @transform_2, window_bounds = array<i64: 1, 512>}, {transform_indices = @transform_3, window_bounds = array<i64: 512, 128>}, {pipeline_mode = #tpu.pipeline_mode<synchronous>, transform_indices = @transform_4, window_bounds = array<i64: 1, 128>}, {pipeline_mode = #tpu.pipeline_mode<synchronous>, transform_indices = @transform_5, window_bounds = array<i64: 8, 128>}]} {
    %c0_i32 = arith.constant 0 : i32
    %0 = arith.cmpi eq, %arg0, %c0_i32 : i32
    %c0_i32_0 = arith.constant 0 : i32
    %1 = arith.cmpi eq, %arg1, %c0_i32_0 : i32
    %2 = arith.andi %0, %1 : i1
    %3 = arith.extui %2 : i1 to i32
    %c0_i32_1 = arith.constant 0 : i32
    %4 = arith.cmpi ne, %3, %c0_i32_1 : i32
    scf.if %4 {
      %cst_15 = arith.constant 0.000000e+00 : f32
      %22 = vector.broadcast %cst_15 : f32 to vector<8x128xf32>
      %c0_16 = arith.constant 0 : index
      %c0_17 = arith.constant 0 : index
      %23 = vector.load %arg6[%c0_16, %c0_17] : memref<1x128xf32, #tpu.memory_space<vmem>>, vector<1x128xf32>
      %24 = vector.broadcast %23 : vector<1x128xf32> to vector<8x128xf32>
      %25 = arith.addf %22, %24 : vector<8x128xf32>
      %c0_18 = arith.constant 0 : index
      %c0_19 = arith.constant 0 : index
      %26 = vector.load %arg9[%c0_18, %c0_19] : memref<8x128xf32, #tpu.memory_space<vmem>>, vector<8x128xf32>
      tpu.vector_store %arg9[%c0_18, %c0_19], %25 {strides = array<i32>} : memref<8x128xf32, #tpu.memory_space<vmem>>, vector<8x128xf32>,
    } else {
    }
    %c0_i32_2 = arith.constant 0 : i32
    %5 = arith.cmpi eq, %arg1, %c0_i32_2 : i32
    %6 = arith.extui %5 : i1 to i32
    %c0_i32_3 = arith.constant 0 : i32
    %7 = arith.cmpi ne, %6, %c0_i32_3 : i32
    scf.if %7 {
      %cst_15 = arith.constant 0.000000e+00 : f32
      %22 = vector.broadcast %cst_15 : f32 to vector<8x512xf32>
      %c0_16 = arith.constant 0 : index
      %c0_17 = arith.constant 0 : index
      %23 = vector.load %arg8[%c0_16, %c0_17] : memref<8x512xf32, #tpu.memory_space<vmem>>, vector<8x512xf32>
      tpu.vector_store %arg8[%c0_16, %c0_17], %22 {strides = array<i32>} : memref<8x512xf32, #tpu.memory_space<vmem>>, vector<8x512xf32>,
    } else {
    }
    %c0 = arith.constant 0 : index
    %c0_4 = arith.constant 0 : index
    %8 = vector.load %arg8[%c0, %c0_4] : memref<8x512xf32, #tpu.memory_space<vmem>>, vector<8x512xf32>
    %c0_5 = arith.constant 0 : index
    %c0_6 = arith.constant 0 : index
    %9 = vector.load %arg2[%c0_5, %c0_6] : memref<8x196xbf16, #tpu.memory_space<vmem>>, vector<8x196xbf16>
    %c0_7 = arith.constant 0 : index
    %c0_8 = arith.constant 0 : index
    %10 = vector.load %arg3[%c0_7, %c0_8] : memref<196x512xbf16, #tpu.memory_space<vmem>>, vector<196x512xbf16>
    %cst = arith.constant dense<0.000000e+00> : vector<8x512xf32>
    %11 = tpu.matmul %9, %10, %cst {dimension_numbers = #tpu.dot_dimension_numbers<[1], [0], [0], [1], [0, 0, 1, 1], [], []>} : vector<8x196xbf16>, vector<196x512xbf16>, vector<8x512xf32> -> vector<8x512xf32>
    %12 = arith.addf %8, %11 : vector<8x512xf32>
    %c0_9 = arith.constant 0 : index
    %c0_10 = arith.constant 0 : index
    %13 = vector.load %arg8[%c0_9, %c0_10] : memref<8x512xf32, #tpu.memory_space<vmem>>, vector<8x512xf32>
    tpu.vector_store %arg8[%c0_9, %c0_10], %12 {strides = array<i32>} : memref<8x512xf32, #tpu.memory_space<vmem>>, vector<8x512xf32>,
    %c0_i32_11 = arith.constant 0 : i32
    %14 = arith.cmpi eq, %arg1, %c0_i32_11 : i32
    %15 = arith.extui %14 : i1 to i32
    %c0_i32_12 = arith.constant 0 : i32
    %16 = arith.cmpi ne, %15, %c0_i32_12 : i32
    scf.if %16 {
      %c0_15 = arith.constant 0 : index
      %c0_16 = arith.constant 0 : index
      %22 = vector.load %arg8[%c0_15, %c0_16] : memref<8x512xf32, #tpu.memory_space<vmem>>, vector<8x512xf32>
      %c0_17 = arith.constant 0 : index
      %c0_18 = arith.constant 0 : index
      %23 = vector.load %arg4[%c0_17, %c0_18] : memref<1x512xf32, #tpu.memory_space<vmem>>, vector<1x512xf32>
      %24 = vector.broadcast %23 : vector<1x512xf32> to vector<8x512xf32>
      %25 = arith.addf %22, %24 : vector<8x512xf32>
      %cst_19 = arith.constant 0.000000e+00 : f32
      %26 = vector.broadcast %cst_19 : f32 to vector<8x512xf32>
      %27 = arith.maximumf %25, %26 : vector<8x512xf32>
      %c0_20 = arith.constant 0 : index
      %c0_21 = arith.constant 0 : index
      %28 = vector.load %arg9[%c0_20, %c0_21] : memref<8x128xf32, #tpu.memory_space<vmem>>, vector<8x128xf32>
      %29 = arith.truncf %27 : vector<8x512xf32> to vector<8x512xbf16>
      %c0_22 = arith.constant 0 : index
      %c0_23 = arith.constant 0 : index
      %30 = vector.load %arg5[%c0_22, %c0_23] : memref<512x128xbf16, #tpu.memory_space<vmem>>, vector<512x128xbf16>
      %cst_24 = arith.constant dense<0.000000e+00> : vector<8x128xf32>
      %31 = tpu.matmul %29, %30, %cst_24 {dimension_numbers = #tpu.dot_dimension_numbers<[1], [0], [0], [1], [0, 0, 1, 1], [], []>} : vector<8x512xbf16>, vector<512x128xbf16>, vector<8x128xf32> -> vector<8x128xf32>
      %32 = arith.addf %28, %31 : vector<8x128xf32>
      %c0_25 = arith.constant 0 : index
      %c0_26 = arith.constant 0 : index
      %33 = vector.load %arg9[%c0_25, %c0_26] : memref<8x128xf32, #tpu.memory_space<vmem>>, vector<8x128xf32>
      tpu.vector_store %arg9[%c0_25, %c0_26], %32 {strides = array<i32>} : memref<8x128xf32, #tpu.memory_space<vmem>>, vector<8x128xf32>,
    } else {
    }
    %c3_i32 = arith.constant 3 : i32
    %17 = arith.cmpi eq, %arg0, %c3_i32 : i32
    %c0_i32_13 = arith.constant 0 : i32
    %18 = arith.cmpi eq, %arg1, %c0_i32_13 : i32
    %19 = arith.andi %17, %18 : i1
    %20 = arith.extui %19 : i1 to i32
    %c0_i32_14 = arith.constant 0 : i32
    %21 = arith.cmpi ne, %20, %c0_i32_14 : i32
    scf.if %21 {
      %c0_15 = arith.constant 0 : index
      %c0_16 = arith.constant 0 : index
      %22 = vector.load %arg9[%c0_15, %c0_16] : memref<8x128xf32, #tpu.memory_space<vmem>>, vector<8x128xf32>
      %cst_17 = arith.constant 0.000000e+00 : f32
      %23 = vector.broadcast %cst_17 : f32 to vector<8x128xf32>
      %24 = arith.maximumf %22, %23 : vector<8x128xf32>
      %c0_18 = arith.constant 0 : index
      %c0_19 = arith.constant 0 : index
      %25 = vector.load %arg7[%c0_18, %c0_19] : memref<8x128xf32, #tpu.memory_space<vmem>>, vector<8x128xf32>
      tpu.vector_store %arg7[%c0_18, %c0_19], %24 {strides = array<i32>} : memref<8x128xf32, #tpu.memory_space<vmem>>, vector<8x128xf32>,
    } else {
    }
    return
  }
  func.func @transform_0(%arg0: i32, %arg1: i32) -> (i32, i32) {
    %c0_i32 = arith.constant 0 : i32
    %c0_i32_0 = arith.constant 0 : i32
    return %c0_i32, %arg1 : i32, i32
  }
  func.func @transform_1(%arg0: i32, %arg1: i32) -> (i32, i32) {
    %c0_i32 = arith.constant 0 : i32
    return %arg1, %arg0 : i32, i32
  }
  func.func @transform_2(%arg0: i32, %arg1: i32) -> (i32, i32) {
    %c0_i32 = arith.constant 0 : i32
    %c0_i32_0 = arith.constant 0 : i32
    return %c0_i32, %arg0 : i32, i32
  }
  func.func @transform_3(%arg0: i32, %arg1: i32) -> (i32, i32) {
    %c0_i32 = arith.constant 0 : i32
    %c0_i32_0 = arith.constant 0 : i32
    return %arg0, %c0_i32 : i32, i32
  }
  func.func @transform_4(%arg0: i32, %arg1: i32) -> (i32, i32) {
    %c0_i32 = arith.constant 0 : i32
    %c0_i32_0 = arith.constant 0 : i32
    %c0_i32_1 = arith.constant 0 : i32
    return %c0_i32, %c0_i32_0 : i32, i32
  }
  func.func @transform_5(%arg0: i32, %arg1: i32) -> (i32, i32) {
    %c0_i32 = arith.constant 0 : i32
    %c0_i32_0 = arith.constant 0 : i32
    %c0_i32_1 = arith.constant 0 : i32
    return %c0_i32, %c0_i32_0 : i32, i32
  }
}

</mosaic_0001>

<bundles_post_ra>
// kernel: _extract_feature_forward.2
= control target key start
LH: loop header
LB: loop body
LE: loop exit
PB: predicated region body
PF: predicated region fallthrough
CT: control target
= control target key end

     0   :  { %s316_s1 = inlined_call_operand.vmem [shape: bf16[256,128], index: 1, kind: input, shape index: {}]   ;;  %s317_s0 = inlined_call_operand.vmem [shape: f32[8,256], index: 0, kind: input, shape index: {}]   ;;  %s318_s2 = inlined_call_operand.vmem [shape: bf16[8,128], index: 2, kind: output, shape index: {}]  }
   0x1   :  { %v228_v0 = vld [vmem:[%s316_s1 + $0x78] sm:$0xff]   ;;  %v230_v2 = vld [vmem:[%s316_s1 + $0x70] sm:$0xff]   ;;  %v232_v4 = vld [vmem:[%s316_s1 + $0x68] sm:$0xff]  }
   0x2   :  { %v229_v1 = vld [vmem:[%s316_s1 + $0x38] sm:$0xff]   ;;  %206 = vmatprep.subr.bf16.mxu0 %v228_v0  ;;  %v231_v3 = vld [vmem:[%s316_s1 + $0x30] sm:$0xff]   ;;  %v233_v5 = vld [vmem:[%s316_s1 + $0x28] sm:$0xff]  }
   0x3   :  { %207 = vmatpush3.bf16.msra.mxu0 %v229_v1  ;;  %v234_v6 = vld [vmem:[%s316_s1 + $0x60] sm:$0xff]   ;;  %v236_v8 = vld [vmem:[%s316_s1 + $0x58] sm:$0xff]   ;;  %v238_v10 = vld [vmem:[%s316_s1 + $0x50] sm:$0xff]  }
   0x4   :  { %208 = vmatprep.subr.bf16.mxu0 %v230_v2  ;;  %v235_v7 = vld [vmem:[%s316_s1 + $0x20] sm:$0xff]   ;;  %v237_v9 = vld [vmem:[%s316_s1 + $0x18] sm:$0xff]   ;;  %v13_v11 = vld [vmem:[%s317_s0 + $0x8] sm:$0xff] }
   0x5   :  { %v15_v12 = vpack.c.bf16 %v13_v11, %v13_v11  ;;  %v239_v13 = vld [vmem:[%s316_s1 + $0x10] sm:$0xff]   ;;  %v240_v14 = vld [vmem:[%s316_s1 + $0x48] sm:$0xff]   ;;  %v242_v16 = vld [vmem:[%s316_s1 + $0x40] sm:$0xff]  }
   0x6   :  { %v241_v15 = vld [vmem:[%s316_s1 + $0x8] sm:$0xff]   ;;  %v243_v17 = vld [vmem:[%s316_s1] sm:$0xff]  }
   0x7   :  { %209 = vmatpush3.bf16.msra.mxu0 %v231_v3  ;;  %176 = vmatprep.mubr.bf16.mxu0 %v15_v12  ;;  %v12_v18 = vld [vmem:[%s317_s0] sm:$0xff] }
   0x8   :  { %210 = vmatprep.subr.bf16.mxu0 %v232_v4  ;;  %v14_v19 = vpack.c.bf16 %v12_v18, %v12_v18 }
   0xb   :  { %211 = vmatpush3.bf16.msra.mxu0 %v233_v5 }
   0xc   :  { %212 = vmatprep.subr.bf16.mxu0 %v234_v6 }
   0xf   :  { %213 = vmatpush3.bf16.msra.mxu0 %v235_v7 }
  0x10   :  { %214 = vmatprep.subr.bf16.mxu0 %v236_v8 }
  0x13   :  { %215 = vmatpush3.bf16.msra.mxu0 %v237_v9 }
  0x14   :  { %216 = vmatprep.subr.bf16.mxu0 %v238_v10 }
  0x17   :  { %217 = vmatpush3.bf16.msra.mxu0 %v239_v13 }
  0x18   :  { %218 = vmatprep.subr.bf16.mxu0 %v240_v14 }
  0x1b   :  { %219 = vmatpush3.bf16.msra.mxu0 %v241_v15 }
  0x1c   :  { %220 = vmatprep.subr.bf16.mxu0 %v242_v16 }
  0x1f   :  { %221 = vmatpush3.bf16.msra.mxu0 %v243_v17 }
  0x22   :  { %177 = vmatmul.mubr.bf16.vlgmr.msra.gmra.mxu0 %v14_v19 }
  0xe2   :  { %v222_v20 = vpop.f32.mrf.mxu0 }
  0xe4   :  { %v223_v21 = vpop.f32.mrf.mxu0 }
  0xe5   :  { %v224_v22 = vadd.f32 %v223_v21, %v222_v20 }
  0xe6   :  { %v225_v23 = vpop.f32.mrf.mxu0 }
  0xe7   :  { %v184_v24 = vpack.c.bf16 %v224_v22, %v224_v22 }
  0xe8   :  { %v226_v25 = vpop.f32.mrf.mxu0 }
  0xe9   :  { %185 = vst [vmem:[%s318_s2] sm:$0xf] %v184_v24 }

// kernel: _extract_feature_forward.3
= control target key start
LH: loop header
LB: loop body
LE: loop exit
PB: predicated region body
PF: predicated region fallthrough
CT: control target
= control target key end

     0   :  { %s1967_s0 = inlined_call_operand.vmem [shape: bf16[8,196], index: 0, kind: input, shape index: {}]   ;;  %s1968_s1 = inlined_call_operand.hbm [shape: bf16[196,2048], index: 1, kind: input, shape index: {}]   ;;  %s1969_s2 = inlined_call_operand.vmem [shape: f32[1,2048], index: 2, kind: input, shape index: {}]   ;;  %s1970_s3 = inlined_call_operand.hbm [shape: bf16[2048,128], index: 3, kind: input, shape index: {}]   ;;  %s1971_s4 = inlined_call_operand.vmem [shape: f32[1,128], index: 4, kind: input, shape index: {}]   ;;  %s1972_s5 = inlined_call_operand.vmem [shape: f32[8,128], index: 5, kind: output, shape index: {}]  }
   0x1   :  { %1973 = sst [smem:[#allocation10_spill]] %s1968_s1 }
   0x2   :  { %10 = vsyncpa [#allocation5], 0 }
   0x3   :  { %12 = vsyncpa [#allocation5 + $0x1], 0 }
   0x4   :  { %13 = vsyncpa [#allocation7], 0 }
   0x5   :  { %15 = vsyncpa [#allocation7 + $0x1], 0  ;;  %s1739_s18 = smov 0   ;;  %s1741_s19 = smov 0  }
   0x6   :  { %s1743_s20 = smov 0   ;;  %s1745_s21 = smov 0  }
   0x7   :  { %s1747_s22 = smov 0   ;;  %s1749_s23 = smov 0  }
   0x8 LB: > { %s1258_s24 = sadd.s32 4294967295, %s1700_s23   ;;  %s33_s25 = sadd.s32 1, %s1696_s22  ;;  %s1700_s23 = sphi %s1749_s23, %s21_s23   ;;  %s1696_s22 = sphi %s1747_s22, %s1982_s22   ;;  %s1692_s21 = sphi %s1745_s21, %s1981_s21   ;;  %s1688_s20 = sphi %s1743_s20, %s1980_s20   ;;  %s1684_s19 = sphi %s1741_s19, %s1979_s19   ;;  %s1680_s18 = sphi %s1739_s18, %s1978_s18  }
   0x9   : > { %p35_p0 = scmp.ge.s32.totalorder %s33_s25, 4  ;;  %s68_s26 = sadd.s32 1, %s1688_s20 }
   0xa   : > { %p75_p1 = scmp.ne.s32.totalorder %s1688_s20, %s1684_s19  ;;  %p76_p2 = scmp.eq.s32.totalorder %s1700_s23, 0 }
   0xb   : > { %s1984_s25 = smov (%p35_p0, %s33_s25), 0  ;;  %p81_p4 = scmp.ne.s32.totalorder %s1684_s19, %s1680_s18 }
   0xc   : > { %p77_p3 = por %p76_p2, %p75_p1  ;;  %s64_s27 = ssub.s32 %s1696_s22, %s1984_s25 }
   0xd   : > { %p82_p5 = scmp.eq.s32.totalorder %s1258_s24, 0  ;;  %p66_p6 = scmp.eq.s32.totalorder %s64_s27, 0 }
   0xe   : > { %p1426_p8 = scmp.lt.s32.totalorder %s1700_s23, 4  ;;  %s1787_s30 = sand.u32 1, %s1688_s20  }
   0xf   : > { %p1778_p7 = por %p82_p5, %p81_p4  ;;  %s1365_s6 = sshll.u32 %s1696_s22, 8 }
  0x10   : > { %s1784_s29 = scalar_select %p66_p6, %s1688_s20, %s68_s26  }
  0x11   : > { %s1413_s7 = smul.u32 400, %s1787_s30  ;;  %s1975_s1 = sld [smem:[#allocation10_spill]] }
  0x12   : > { %p1794_p9 = pnand %p1426_p8, %p77_p3  ;;  %p1267_p10 = scmp.ge.s32.totalorder %s1700_s23, 1 }
  0x13   : > { %s215_s12 = scalar_lea.vmem [#allocation4], %s1413_s7  ;;  %s212_s14 = scalar_lea.sflag [#allocation5], %s1787_s30 }
  0x14   : > { %s225_s13 = sshll.u32 %s215_s12, 4  ;;  %p1592_p11 = pneg %p1794_p9  ;;  %s226_s13 = int_to_ptr.vmem [resolvable:$true] %s225_s13 }
  0x15   : > { %s1603_s15 = scalar_lea.vmem %s226_s13, 6400  ;;  %s1702_s16 = smov [#allocation4]  }
  0x16   : > { %p1604_p12 = scmp.ne.s32.totalorder %s226_s13, %s1603_s15  ;;  %s1608_s17 = sshll.u32 %s1702_s16, 4  ;;  %s1609_s17 = int_to_ptr.vmem [resolvable:$false] %s1608_s17 }
  0x17   : > { %s224_s10 = scalar_lea.hbm %s1975_s1, %s1365_s6  ;;  %s1610_s18 = scalar_lea.vmem %s1609_s17, 12800 }
  0x18   : > { %p1606_p13 = pnand %p1604_p12, %p1592_p11  ;;  %p1611_p1 = scmp.lt.s32.totalorder %s226_s13, %s1609_s17 }
  0x19   : > { %p1612_p2 = scmp.lt.s32.totalorder %s1610_s18, %s1603_s15 }
  0x1a   : > { %p1607_p0 = pneg %p1606_p13 }
  0x1b   : > { %p1613_p3 = por %p1612_p2, %p1611_p1 }
  0x1d   : > { %p1614_p4 = pnand %p1613_p3, %p1607_p0 }
  0x1f   : > { %1617 = shalt.err (!%p1614_p4)
}
  0x20   : > { %s1703_s24 = smov 1024   ;;  %s1704_s26 = smov 256  }
  0x21   : > { %s1705_s27 = smov 16   ;;  %p262_p5 = scmp.lt.s32.totalorder %s1700_s23, 5 }
  0x22   : > { %1422 = dma.hbm_to_vmem [thread:$0]  (!%p1794_p9), %s224_s10, 6400, %s226_s13, %s212_s14, %s1703_s24, %s1704_s26, %s1705_s27  }
  0x23   : > { %s1264_s6 = sshll.u32 %s1787_s30, 8  ;;  %s1366_s7 = sshll.u32 %s1696_s22, 12 }
  0x24   : > { %p1812_p6 = pnand %p1267_p10, %p262_p5  ;;  %s253_s15 = scalar_lea.hbm %s1970_s3, %s1366_s7 }
  0x25   : > { %s247_s16 = scalar_lea.vmem [#allocation6], %s1264_s6  ;;  %s244_s18 = scalar_lea.sflag [#allocation7], %s1787_s30 }
  0x26   : > { %s254_s17 = sshll.u32 %s247_s16, 4  ;;  %s1706_s10 = smov [#allocation6]   ;;  %s255_s17 = int_to_ptr.vmem [resolvable:$true] %s254_s17 }
  0x27   : > { %s1631_s1 = scalar_lea.vmem %s255_s17, 4096  ;;  %s1636_s13 = sshll.u32 %s1706_s10, 4  ;;  %s1637_s13 = int_to_ptr.vmem [resolvable:$false] %s1636_s13 }
  0x28   : > { %p1632_p8 = scmp.ne.s32.totalorder %s255_s17, %s1631_s1  ;;  %s1638_s14 = scalar_lea.vmem %s1637_s13, 8192 }
  0x29   : > { %p1639_p10 = scmp.lt.s32.totalorder %s255_s17, %s1637_s13  ;;  %p1640_p0 = scmp.lt.s32.totalorder %s1638_s14, %s1631_s1 }
  0x2a   : > { %p1634_p12 = pnand %p1632_p8, %p1592_p11 }
  0x2b   : > { %p1641_p1 = por %p1640_p0, %p1639_p10 }
  0x2c   : > { %p1635_p13 = pneg %p1634_p12 }
  0x2e   : > { %p1642_p2 = pnand %p1641_p1, %p1635_p13 }
  0x30   : > { %1645 = shalt.err (!%p1642_p2)
}
  0x31   : > { %s1707_s24 = smov 64   ;;  %s1708_s26 = smov 4  }
  0x32   : > { %1425 = dma.hbm_to_vmem [thread:$0]  (!%p1794_p9), %s253_s15, 4096, %s255_s17, %s244_s18, %s1707_s24, %s1707_s24, %s1708_s26  }
  0x33   : > { %266 = sbr.rel (%p1812_p6) target bundleno = 534 (0x216), region = 40  ;;  %s268_s30 = sand.u32 (!%p1812_p6), 1, %s1684_s19  }
  0x34   : > { %s1414_s27 = smul.u32 (!%p1812_p6), 400, %s268_s30  ;;  %s269_s6 = scalar_lea.sflag (!%p1812_p6), [#allocation5], %s268_s30 }
  0x36   : > { %s1828_s7 = scalar_lea.vmem (!%p1812_p6), [#allocation4], %s1414_s27 }
  0x38   : > { %1671 = dma.done.wait (%p1778_p7), %s269_s6, 6400  }
  0x39   : > { %1673 = vsyncadd (%p1778_p7), %s269_s6, 4294960896  ;;  %s1268_s1 = sshll.u32 %s268_s30, 8  ;;  %s278_s9 = scalar_lea.sflag [#allocation7], %s268_s30 }
  0x3a   : > { %s1834_s11 = scalar_lea.vmem [#allocation6], %s1268_s1 }
  0x3b   : > { %1675 = dma.done.wait (%p1778_p7), %s278_s9, 4096  }
  0x3c   : > { %1677 = vsyncadd (%p1778_p7), %s278_s9, 4294963200  ;;  %s1269_s8 = sshll.u32 %s1692_s21, 2  ;;  %p332_p9 = scmp.eq.s32.totalorder %s1692_s21, 0 }
  0x3d   : > { %p326_p11 = scmp.lt.s32.totalorder %s1269_s8, 15  ;;  %v1271_v0 = vld [vmem:[%s1971_s4] ss:$0 sm:$0xff] (%p332_p9) }
  0x3e   : > { %337 = sbr.rel (!%p332_p9) target bundleno = 67 (0x43), region = 52  ;;  %346 = vst [vmem:[#allocation3] sm:$0xff] (%p332_p9), %v1271_v0 }
  0x3f   : > { %s1986_s8 = smov (!%p326_p11, %s1269_s8), 15 }
  0x40   : > { %s328_s16 = scalar_lea.vmem %s1969_s2, %s1986_s8 }
  0x43 PF: > { %v1480_v1 = vld [vmem:[%s1828_s7 + $0xe4] ss:$16 sps:$4 sm:$0xff]   ;;  %v1482_v2 = vld [vmem:[%s1828_s7 + $0xec] ss:$16 sps:$4 sm:$0xff]   ;;  %v1484_v3 = vld [vmem:[%s1828_s7 + $0xe0] ss:$16 sps:$4 sm:$0xff]  }
  0x44   : > { %682 = vmatprep.subr.bf16.mxu0 %v1480_v1  ;;  %v1485_v4 = vld [vmem:[%s1828_s7 + $0xe8] ss:$16 sps:$4 sm:$0xff]   ;;  %723 = vmatprep.subr.bf16.mxu1 %v1482_v2  ;;  %v1486_v5 = vld [vmem:[%s1828_s7 + $0xc4] ss:$16 sps:$4 sm:$0xff]   ;;  %v1488_v6 = vld [vmem:[%s1828_s7 + $0xcc] ss:$16 sps:$4 sm:$0xff]  }
  0x45   : > { %683 = vmatpush1.bf16.msra.mxu0 %v1484_v3  ;;  %724 = vmatpush1.bf16.msra.mxu1 %v1485_v4  ;;  %v1490_v7 = vld [vmem:[%s1828_s7 + $0xc0] ss:$16 sps:$4 sm:$0xff]   ;;  %v1491_v8 = vld [vmem:[%s1828_s7 + $0xc8] ss:$16 sps:$4 sm:$0xff]   ;;  %v1492_v9 = vld [vmem:[%s1828_s7 + $0xa4] ss:$16 sps:$4 sm:$0xff]  }
  0x46   : > { %684 = vmatprep.subr.bf16.mxu0 %v1486_v5  ;;  %725 = vmatprep.subr.bf16.mxu1 %v1488_v6  ;;  %v1494_v10 = vld [vmem:[%s1828_s7 + $0xac] ss:$16 sps:$4 sm:$0xff]   ;;  %v1496_v11 = vld [vmem:[%s1828_s7 + $0xa0] ss:$16 sps:$4 sm:$0xff]   ;;  %v1497_v12 = vld [vmem:[%s1828_s7 + $0xa8] ss:$16 sps:$4 sm:$0xff]  }
  0x47   : > { %v1498_v13 = vld [vmem:[%s1828_s7 + $0x84] ss:$16 sps:$4 sm:$0xff]   ;;  %v1500_v14 = vld [vmem:[%s1828_s7 + $0x8c] ss:$16 sps:$4 sm:$0xff]   ;;  %v1502_v15 = vld [vmem:[%s1828_s7 + $0x80] ss:$16 sps:$4 sm:$0xff]  }
  0x48   : > { %v1503_v16 = vld [vmem:[%s1828_s7 + $0x88] ss:$16 sps:$4 sm:$0xff]   ;;  %v1504_v17 = vld [vmem:[%s1828_s7 + $0x64] ss:$16 sps:$4 sm:$0xff]   ;;  %v1506_v18 = vld [vmem:[%s1828_s7 + $0x6c] ss:$16 sps:$4 sm:$0xff]  }
  0x49   : > { %685 = vmatpush1.bf16.msra.mxu0 %v1490_v7  ;;  %726 = vmatpush1.bf16.msra.mxu1 %v1491_v8  ;;  %v1508_v19 = vld [vmem:[%s1828_s7 + $0x60] ss:$16 sps:$4 sm:$0xff]   ;;  %v1509_v20 = vld [vmem:[%s1828_s7 + $0x68] ss:$16 sps:$4 sm:$0xff]   ;;  %v1510_v21 = vld [vmem:[%s1828_s7 + $0x44] ss:$16 sps:$4 sm:$0xff]  }
  0x4a   : > { %686 = vmatprep.subr.bf16.mxu0 %v1492_v9  ;;  %727 = vmatprep.subr.bf16.mxu1 %v1494_v10  ;;  %v1512_v22 = vld [vmem:[%s1828_s7 + $0x4c] ss:$16 sps:$4 sm:$0xff]   ;;  %v1514_v23 = vld [vmem:[%s1828_s7 + $0x40] ss:$16 sps:$4 sm:$0xff]   ;;  %v1515_v24 = vld [vmem:[%s1828_s7 + $0x48] ss:$16 sps:$4 sm:$0xff]  }
  0x4b   : > { %v1516_v25 = vld [vmem:[%s1828_s7 + $0x24] ss:$16 sps:$4 sm:$0xff]   ;;  %v1518_v26 = vld [vmem:[%s1828_s7 + $0x2c] ss:$16 sps:$4 sm:$0xff]   ;;  %v1520_v27 = vld [vmem:[%s1828_s7 + $0x20] ss:$16 sps:$4 sm:$0xff]  }
  0x4c   : > { %v1521_v28 = vld [vmem:[%s1828_s7 + $0x28] ss:$16 sps:$4 sm:$0xff]   ;;  %v1522_v29 = vld [vmem:[%s1828_s7 + $0x4] ss:$16 sps:$4 sm:$0xff]   ;;  %v1524_v30 = vld [vmem:[%s1828_s7 + $0xc] ss:$16 sps:$4 sm:$0xff]  }
  0x4d   : > { %687 = vmatpush1.bf16.msra.mxu0 %v1496_v11  ;;  %728 = vmatpush1.bf16.msra.mxu1 %v1497_v12  ;;  %v407_v31 = vld [vmem:[%s1828_s7 + $0x180] sm:$0x33]  ;;  %v408_v32 = vld [vmem:[%s1828_s7 + $0x188] sm:$0x33]  ;;  %vm669_vm0 = vcmask 1041408   ;;  %vm665_vm1 = vcmask 556032  }
  0x4e   : > { %688 = vmatprep.subr.bf16.mxu0 %v1498_v13  ;;  %729 = vmatprep.subr.bf16.mxu1 %v1500_v14  ;;  %v1526_v33 = vld [vmem:[%s1828_s7] ss:$16 sps:$4 sm:$0xff]   ;;  %v1527_v34 = vld [vmem:[%s1828_s7 + $0x8] ss:$16 sps:$4 sm:$0xff]   ;;  %v1322_v35 = vcombine.low %v407_v31, %v407_v31  ;;  %v1323_v36 = vcombine.high %v407_v31, %v407_v31  ;;  %v1325_v37 = vcombine.high %v408_v32, %v408_v32  ;;  %v1532_v40 = vld [vmem:[%s1828_s7 + $0x164] ss:$16 sps:$4 sm:$0xff]  }
  0x4f   : > { %v1324_v38 = vcombine.low %v408_v32, %v408_v32  ;;  %v1534_v41 = vld [vmem:[%s1828_s7 + $0x16c] ss:$16 sps:$4 sm:$0xff]   ;;  %v1536_v44 = vld [vmem:[%s1828_s7 + $0x160] ss:$16 sps:$4 sm:$0xff]   ;;  %v1537_v46 = vld [vmem:[%s1828_s7 + $0x168] ss:$16 sps:$4 sm:$0xff]  }
  0x50   : > { %v671_v39 = vsel %vm669_vm0, %v1322_v35, 0  ;;  %v358_v43 = vld [vmem:[%s1967_s0] sm:$0xff]  ;;  %v1538_v47 = vld [vmem:[%s1828_s7 + $0x144] ss:$16 sps:$4 sm:$0xff]   ;;  %v1542_v49 = vld [vmem:[%s1828_s7 + $0x140] ss:$16 sps:$4 sm:$0xff]  }
  0x51   : > { %689 = vmatpush1.bf16.msra.mxu0 %v1502_v15  ;;  %730 = vmatpush1.bf16.msra.mxu1 %v1503_v16  ;;  %v677_v42 = vsel %vm669_vm0, %v1324_v38, 0  ;;  %v1273_v45 = vcombine.high %v358_v43, %v358_v43  ;;  %v1540_v48 = vld [vmem:[%s1828_s7 + $0x14c] ss:$16 sps:$4 sm:$0xff]   ;;  %v1543_v50 = vld [vmem:[%s1828_s7 + $0x148] ss:$16 sps:$4 sm:$0xff]   ;;  %v1272_v62 = vcombine.low %v358_v43, %v358_v43  ;;  %v1562_v0 = vld [vmem:[%s1834_s11 + $0x70] sm:$0xff]  }
  0x52   : > { %690 = vmatprep.subr.bf16.mxu0 %v1504_v17  ;;  %731 = vmatprep.subr.bf16.mxu1 %v1506_v18  ;;  %v1544_v51 = vld [vmem:[%s1828_s7 + $0x124] ss:$16 sps:$4 sm:$0xff]   ;;  %v1546_v52 = vld [vmem:[%s1828_s7 + $0x12c] ss:$16 sps:$4 sm:$0xff]   ;;  %v1548_v53 = vld [vmem:[%s1828_s7 + $0x120] ss:$16 sps:$4 sm:$0xff]  }
  0x53   : > { %1327 = vmatprep.mubr.msk.bf16.mxu0 %vm665_vm1, %v1273_v45  ;;  %1329 = vmatprep.mubr.msk.bf16.mxu1 %vm665_vm1, %v1273_v45  ;;  %v1549_v54 = vld [vmem:[%s1828_s7 + $0x128] ss:$16 sps:$4 sm:$0xff]   ;;  %v1550_v55 = vld [vmem:[%s1828_s7 + $0x104] ss:$16 sps:$4 sm:$0xff]   ;;  %v1552_v56 = vld [vmem:[%s1828_s7 + $0x10c] ss:$16 sps:$4 sm:$0xff]  }
  0x54   : > { %v1554_v57 = vld [vmem:[%s1828_s7 + $0x100] ss:$16 sps:$4 sm:$0xff]   ;;  %v1555_v58 = vld [vmem:[%s1828_s7 + $0x108] ss:$16 sps:$4 sm:$0xff]   ;;  %p1152_p7 = scmp.eq.s32.totalorder %s1692_s21, 3 }
  0x55   : > { %691 = vmatpush1.bf16.msra.mxu0 %v1508_v19  ;;  %732 = vmatpush1.bf16.msra.mxu1 %v1509_v20  ;;  %v1558_v59 = vld [vmem:[%s1834_s11 + $0x78] sm:$0xff]   ;;  %v1563_v1 = vld [vmem:[%s1834_s11 + $0xf0] sm:$0xff]   ;;  %v1566_v4 = vld [vmem:[%s1834_s11 + $0x68] sm:$0xff]  }
  0x56   : > { %692 = vmatprep.subr.bf16.mxu0 %v1510_v21  ;;  %733 = vmatprep.subr.bf16.mxu1 %v1512_v22  ;;  %v1559_v60 = vld [vmem:[%s1834_s11 + $0xf8] sm:$0xff]   ;;  %v1564_v2 = vld [vmem:[%s1834_s11 + $0x30] sm:$0xff]   ;;  %v1567_v5 = vld [vmem:[%s1834_s11 + $0xe8] sm:$0xff]  }
  0x57   : > { %v1560_v61 = vld [vmem:[%s1834_s11 + $0x38] sm:$0xff]   ;;  %v1565_v3 = vld [vmem:[%s1834_s11 + $0xb0] sm:$0xff]   ;;  %v1568_v6 = vld [vmem:[%s1834_s11 + $0x28] sm:$0xff]  }
  0x58   : > { %v1561_v63 = vld [vmem:[%s1834_s11 + $0xb8] sm:$0xff]   ;;  %v1569_v7 = vld [vmem:[%s1834_s11 + $0xa8] sm:$0xff]   ;;  %v1570_v8 = vld [vmem:[%s1834_s11 + $0x60] sm:$0xff]  }
  0x59   : > { %693 = vmatpush1.bf16.msra.mxu0 %v1514_v23  ;;  %734 = vmatpush1.bf16.msra.mxu1 %v1515_v24  ;;  %v1571_v9 = vld [vmem:[%s1834_s11 + $0xe0] sm:$0xff]   ;;  %v1574_v12 = vld [vmem:[%s1834_s11 + $0x58] sm:$0xff]   ;;  %v1578_v16 = vld [vmem:[%s1834_s11 + $0x50] sm:$0xff]  }
  0x5a   : > { %694 = vmatprep.subr.bf16.mxu0 %v1516_v25  ;;  %735 = vmatprep.subr.bf16.mxu1 %v1518_v26  ;;  %v1572_v10 = vld [vmem:[%s1834_s11 + $0x20] sm:$0xff]   ;;  %v1575_v13 = vld [vmem:[%s1834_s11 + $0xd8] sm:$0xff]   ;;  %v1579_v17 = vld [vmem:[%s1834_s11 + $0xd0] sm:$0xff]  }
  0x5b   : > { %v1573_v11 = vld [vmem:[%s1834_s11 + $0xa0] sm:$0xff]   ;;  %v1576_v14 = vld [vmem:[%s1834_s11 + $0x18] sm:$0xff]   ;;  %v1580_v18 = vld [vmem:[%s1834_s11 + $0x10] sm:$0xff]  }
  0x5c   : > { %v1577_v15 = vld [vmem:[%s1834_s11 + $0x98] sm:$0xff]   ;;  %v1581_v19 = vld [vmem:[%s1834_s11 + $0x90] sm:$0xff]   ;;  %v1582_v20 = vld [vmem:[%s1834_s11 + $0x48] sm:$0xff]  }
  0x5d   : > { %695 = vmatpush1.bf16.msra.mxu0 %v1520_v27  ;;  %736 = vmatpush1.bf16.msra.mxu1 %v1521_v28  ;;  %v1583_v21 = vld [vmem:[%s1834_s11 + $0xc8] sm:$0xff]   ;;  %v1586_v24 = vld [vmem:[%s1834_s11 + $0x40] sm:$0xff]   ;;  %v781_v28 = vlaneseq  ;;  %v779_v32 = vld [vmem:[%s328_s16] sm:$0xf] }
  0x5e   : > { %696 = vmatprep.subr.bf16.mxu0 %v1522_v29  ;;  %737 = vmatprep.subr.bf16.mxu1 %v1524_v30  ;;  %v1584_v22 = vld [vmem:[%s1834_s11 + $0x8] sm:$0xff]   ;;  %v1587_v25 = vld [vmem:[%s1834_s11 + $0xc0] sm:$0xff]  }
  0x5f   : > { %v1585_v23 = vld [vmem:[%s1834_s11 + $0x88] sm:$0xff]   ;;  %v1588_v26 = vld [vmem:[%s1834_s11] sm:$0xff]   ;;  %v782_v29 = vshrl.u32 %v781_v28, 7 }
  0x60   : > { %v1589_v27 = vld [vmem:[%s1834_s11 + $0x80] sm:$0xff]  }
  0x61   : > { %697 = vmatpush1.bf16.msra.mxu0 %v1526_v33  ;;  %738 = vmatpush1.bf16.msra.mxu1 %v1527_v34  ;;  %v783_v30 = vsub.s32 0, %v782_v29  ;;  %v791_v31 = vsub.s32 2, %v782_v29  ;;  %v787_v33 = vsub.s32 1, %v782_v29  ;;  %v795_v34 = vsub.s32 3, %v782_v29 }
  0x62   : > { %1326 = vmatprep.subr.msk.bf16.mxu0 %vm669_vm0, %v1323_v36  ;;  %1328 = vmatprep.subr.msk.bf16.mxu1 %vm669_vm0, %v1325_v37 }
  0x63   : > { %v784_v35 = vrot.slane %v779_v32, %v783_v30  ;;  %v792_v36 = vrot.slane %v779_v32, %v791_v31  ;;  %v788_v37 = vrot.slane %v779_v32, %v787_v33  ;;  %v796_v38 = vrot.slane %v779_v32, %v795_v34 }
  0x65   : > { %705 = vmatpush2.bf16.msra.mxu0 %v671_v39  ;;  %746 = vmatpush2.bf16.msra.mxu1 %v677_v42 }
  0x66   : > { %706 = vmatprep.subr.bf16.mxu0 %v1532_v40  ;;  %747 = vmatprep.subr.bf16.mxu1 %v1534_v41 }
  0x69   : > { %707 = vmatpush2.bf16.msra.mxu0 %v1536_v44  ;;  %748 = vmatpush2.bf16.msra.mxu1 %v1537_v46 }
  0x6a   : > { %708 = vmatprep.subr.bf16.mxu0 %v1538_v47  ;;  %749 = vmatprep.subr.bf16.mxu1 %v1540_v48 }
  0x6d   : > { %709 = vmatpush2.bf16.msra.mxu0 %v1542_v49  ;;  %750 = vmatpush2.bf16.msra.mxu1 %v1543_v50 }
  0x6e   : > { %710 = vmatprep.subr.bf16.mxu0 %v1544_v51  ;;  %751 = vmatprep.subr.bf16.mxu1 %v1546_v52 }
  0x71   : > { %711 = vmatpush2.bf16.msra.mxu0 %v1548_v53  ;;  %752 = vmatpush2.bf16.msra.mxu1 %v1549_v54 }
  0x72   : > { %712 = vmatprep.subr.bf16.mxu0 %v1550_v55  ;;  %753 = vmatprep.subr.bf16.mxu1 %v1552_v56 }
  0x75   : > { %713 = vmatpush2.bf16.msra.mxu0 %v1554_v57  ;;  %754 = vmatpush2.bf16.msra.mxu1 %v1555_v58 }
  0x76   : > { %1369 = vmatprep.subr.bf16.mxu0 %v1558_v59  ;;  %1391 = vmatprep.subr.bf16.mxu1 %v1559_v60 }
  0x78   : > { %715 = vmatmul.mubr.bf16.vlgmr.msra.gmra.mxu0 %v1272_v62  ;;  %756 = vmatmul.mubr.bf16.vlgmr.msra.gmra.mxu1 %v1272_v62 }
  0x79   : > { %1370 = vmatpush3.bf16.msra.mxu0 %v1560_v61  ;;  %1392 = vmatpush3.bf16.msra.mxu1 %v1561_v63 }
  0x7a   : > { %1371 = vmatprep.subr.bf16.mxu0 %v1562_v0  ;;  %1393 = vmatprep.subr.bf16.mxu1 %v1563_v1  ;;  %v809_v1 = vld [vmem:[#allocation3] sm:$0xff] }
  0x7d   : > { %1372 = vmatpush3.bf16.msra.mxu0 %v1564_v2  ;;  %1394 = vmatpush3.bf16.msra.mxu1 %v1565_v3 }
  0x7e   : > { %1373 = vmatprep.subr.bf16.mxu0 %v1566_v4  ;;  %1395 = vmatprep.subr.bf16.mxu1 %v1567_v5 }
  0x81   : > { %1374 = vmatpush3.bf16.msra.mxu0 %v1568_v6  ;;  %1396 = vmatpush3.bf16.msra.mxu1 %v1569_v7 }
  0x82   : > { %1375 = vmatprep.subr.bf16.mxu0 %v1570_v8  ;;  %1397 = vmatprep.subr.bf16.mxu1 %v1571_v9 }
  0x85   : > { %1376 = vmatpush3.bf16.msra.mxu0 %v1572_v10  ;;  %1398 = vmatpush3.bf16.msra.mxu1 %v1573_v11 }
  0x86   : > { %1377 = vmatprep.subr.bf16.mxu0 %v1574_v12  ;;  %1399 = vmatprep.subr.bf16.mxu1 %v1575_v13 }
  0x89   : > { %1378 = vmatpush3.bf16.msra.mxu0 %v1576_v14  ;;  %1400 = vmatpush3.bf16.msra.mxu1 %v1577_v15 }
  0x8a   : > { %1379 = vmatprep.subr.bf16.mxu0 %v1578_v16  ;;  %1401 = vmatprep.subr.bf16.mxu1 %v1579_v17 }
  0x8d   : > { %1380 = vmatpush3.bf16.msra.mxu0 %v1580_v18  ;;  %1402 = vmatpush3.bf16.msra.mxu1 %v1581_v19 }
  0x8e   : > { %1381 = vmatprep.subr.bf16.mxu0 %v1582_v20  ;;  %1403 = vmatprep.subr.bf16.mxu1 %v1583_v21 }
  0x91   : > { %1382 = vmatpush3.bf16.msra.mxu0 %v1584_v22  ;;  %1404 = vmatpush3.bf16.msra.mxu1 %v1585_v23 }
  0x92   : > { %1383 = vmatprep.subr.bf16.mxu0 %v1586_v24  ;;  %1405 = vmatprep.subr.bf16.mxu1 %v1587_v25 }
  0x95   : > { %1384 = vmatpush3.bf16.msra.mxu0 %v1588_v26  ;;  %1406 = vmatpush3.bf16.msra.mxu1 %v1589_v27 }
 0x138   : > { %v716_v39 = vpop.f32.mrf.mxu0  ;;  %v757_v40 = vpop.f32.mrf.mxu1 }
 0x139   : > { %v801_v41 = vadd.f32 %v784_v35, %v716_v39  ;;  %v803_v42 = vadd.f32 %v792_v36, %v757_v40 }
 0x13a   : > { %v718_v43 = vpop.f32.mrf.mxu0  ;;  %v759_v44 = vpop.f32.mrf.mxu1 }
 0x13b   : > { %v802_v45 = vadd.f32 %v788_v37, %v718_v43  ;;  %v804_v46 = vadd.f32 %v796_v38, %v759_v44  ;;  %v805_v47 = vmax.f32 %v801_v41, 0.0  ;;  %v807_v48 = vmax.f32 %v803_v42, 0.0 }
 0x13c   : > { %v720_v49 = vpop.f32.mrf.mxu0  ;;  %v761_v50 = vpop.f32.mrf.mxu1 }
 0x13d   : > { %v806_v51 = vmax.f32 %v802_v45, 0.0  ;;  %v808_v52 = vmax.f32 %v804_v46, 0.0  ;;  %v810_v57 = vpack.c.bf16 %v805_v47, %v805_v47  ;;  %v812_v58 = vpack.c.bf16 %v807_v48, %v807_v48 }
 0x13e   : > { %v721_v53 = vpop.f32.mrf.mxu0  ;;  %v762_v54 = vpop.f32.mrf.mxu1 }
 0x13f   : > { %v811_v55 = vpack.c.bf16 %v806_v51, %v806_v51  ;;  %v813_v56 = vpack.c.bf16 %v808_v52, %v808_v52 }
 0x141   : > { %1102 = vmatprep.mubr.bf16.mxu0 %v811_v55  ;;  %1142 = vmatprep.mubr.bf16.mxu1 %v813_v56 }
 0x142   : > { %1103 = vmatmul.mubr.bf16.vlgmr.msra.gmra.mxu0 %v810_v57  ;;  %1143 = vmatmul.mubr.bf16.vlgmr.msra.gmra.mxu1 %v812_v58 }
 0x202   : > { %v1385_v59 = vpop.f32.mrf.mxu0  ;;  %v1407_v60 = vpop.f32.mrf.mxu1 }
 0x204   : > { %v1386_v61 = vpop.f32.mrf.mxu0  ;;  %v1408_v62 = vpop.f32.mrf.mxu1 }
 0x205   : > { %v1387_v63 = vadd.f32 %v1386_v61, %v1385_v59  ;;  %v1409_v0 = vadd.f32 %v1408_v62, %v1407_v60 }
 0x206   : > { %v1388_v2 = vpop.f32.mrf.mxu0  ;;  %v1410_v3 = vpop.f32.mrf.mxu1 }
 0x207   : > { %v1145_v4 = vadd.f32 %v1409_v0, %v1387_v63  ;;  %1156 = sbr.rel (!%p1152_p7) target bundleno = 534 (0x216), region = 64 }
 0x208   : > { %v1389_v5 = vpop.f32.mrf.mxu0  ;;  %v1411_v6 = vpop.f32.mrf.mxu1 }
 0x209   : > { %v1150_v7 = vadd.f32 %v1145_v4, %v809_v1 }
 0x20b   : > { %1151 = vst [vmem:[#allocation3] sm:$0xff] %v1150_v7 }
 0x212   : > { %v1157_v8 = vld [vmem:[#allocation3] sm:$0xff] }
 0x213   : > { %v1158_v9 = vmax.f32 %v1157_v8, 0.0 }
 0x215   : > { %1159 = vst [vmem:[%s1972_s5] sm:$0xff] %v1158_v9 }
 0x216 PF: > { %s21_s23 = sadd.s32 1, %s1700_s23   ;;  %s1978_s18 = smov %s1684_s19 }
 0x217   : > { %p18_p3 = scmp.ge.s32.totalorder %s21_s23, 6   ;;  %s1979_s19 = smov %s1688_s20 }
 0x218   : > { %s1980_s20 = smov %s1784_s29  ;;  %s1981_s21 = smov %s1696_s22 }
 0x219   : > { %s1982_s22 = smov %s1984_s25  ;;  %20 = sbr.rel (!%p18_p3) target bundleno = 8 (0x8), region = 111 }
 0x21e   :  { %1171 = vsyncpa [#allocation5], 1 }
 0x21f   :  { %1173 = vsyncpa [#allocation5 + $0x1], 1 }
 0x220   :  { %1174 = vsyncpa [#allocation7], 1 }
 0x221   :  { %1176 = vsyncpa [#allocation7 + $0x1], 1 }

</bundles_post_ra>
